<compile_context>
chip_gen: v5e
topology: v5e:2x2
jax: 0.10.0
libtpu: 0.0.40
codegen_flags: <defaults>
</compile_context>

<pallas_src>
import functools

import jax
import jax.numpy as jnp
from jax.experimental import pallas as pl
from jax.experimental.pallas import tpu as pltpu


def _round_up(n, m):
    return ((n + m - 1) // m) * m


# ---------------------------------------------------------------------------
# One-time hardware / feature probes (cached).
# ---------------------------------------------------------------------------
@functools.lru_cache(maxsize=None)
def _vmem_capacity_bytes():
    """Per-core VMEM capacity; conservative (v7x = 64 MiB) if the query fails."""
    try:
        return int(pltpu.get_tpu_info().vmem_capacity_bytes)
    except Exception:  # noqa: BLE001
        return 64 << 20


@functools.lru_cache(maxsize=None)
def _single_buffer_params_supported():
    """Probe whether pipeline_mode=pl.Buffered(1) lowers correctly on this JAX/TPU."""
    try:
        buffered = pl.Buffered(1)

        def probe_kernel(w_ref, x_ref, o_ref):
            o_ref[...] = x_ref[...] + w_ref[...]

        w = jnp.ones((8, 128), jnp.float32)
        x = jnp.arange(16 * 128, dtype=jnp.float32).reshape(16, 128)
        out = pl.pallas_call(
            probe_kernel,
            out_shape=jax.ShapeDtypeStruct((16, 128), jnp.float32),
            grid=(2,),
            in_specs=[
                pl.BlockSpec((8, 128), lambda i: (0, 0), pipeline_mode=buffered),
                pl.BlockSpec((8, 128), lambda i: (i, 0)),
            ],
            out_specs=pl.BlockSpec((8, 128), lambda i: (i, 0)),
        )(w, x)
        return bool(jnp.allclose(out, x + 1.0))
    except Exception:  # noqa: BLE001 — older JAX or unsupported buffer_count
        return False


def _param_spec(shape, grid_rank, single_buffer):
    """Constant-index BlockSpec (weights stay resident in VMEM across grid steps)."""
    zeros = (0,) * len(shape)
    index_map = (lambda i: zeros) if grid_rank == 1 else (lambda i, k: zeros)
    if single_buffer:
        return pl.BlockSpec(shape, index_map, pipeline_mode=pl.Buffered(1))
    return pl.BlockSpec(shape, index_map)


# ---------------------------------------------------------------------------
# Kernels
# ---------------------------------------------------------------------------
def critic_kernel_fused(x_ref, a_ref,
                        w1_ref, b1_ref,
                        w2x_ref, w2a_ref, b2_ref,
                        w3_ref, b3_ref,
                        out_ref):
    """Whole-MLP kernel, all weights resident.

    x:(TB,Sp) a:(TB,Ap) bf16; weights bf16 (in,out, lane-padded); biases f32
    (1,H); out:(TB,Op) f32 lane-dense (caller slices [:, :O])."""
    wt = w1_ref.dtype

    # fc2 action-path partial (independent of the fc1 chain; the LLO scheduler
    # co-issues these MXU pushes either way — kept since it costs nothing).
    h2 = jnp.dot(a_ref[...], w2a_ref[...],
                 preferred_element_type=jnp.float32) + b2_ref[...]

    # fc1 + ReLU (fused bf16 down-cast: only a bf16 copy of h1 stays live).
    h1 = jnp.dot(x_ref[...], w1_ref[...],
                 preferred_element_type=jnp.float32) + b1_ref[...]
    h1 = jnp.maximum(h1, 0.0).astype(wt)

    # fc2 state-path (split-weight form of cat([h1, a]) @ w2) + ReLU.
    h2 = h2 + jnp.dot(h1, w2x_ref[...], preferred_element_type=jnp.float32)
    h2 = jnp.maximum(h2, 0.0).astype(wt)

    # fc3 (no activation), lane-dense f32 store.
    out_ref[...] = jnp.dot(h2, w3_ref[...],
                           preferred_element_type=jnp.float32) + b3_ref[...]


def critic_kernel_tiled(x_ref, a_ref,
                        w1_ref, b1_ref,
                        w2x_ref, w2a_ref, b2_ref,
                        w3_ref, b3_ref,
                        out_ref,
                        h1_ref, acc_ref):
    """Large-S path: fc2 output columns / fc3 contraction tiled over H2 (grid
    axis 1, 'arbitrary'). w1/b1/b3 resident; w2x/w2a/b2/w3 streamed in TK tiles.
    h1 (bf16) and the fc3 f32 accumulator live in VMEM scratch."""
    k = pl.program_id(1)
    wt = w1_ref.dtype

    @pl.when(k == 0)
    def _():
        h1 = jnp.dot(x_ref[...], w1_ref[...],
                     preferred_element_type=jnp.float32) + b1_ref[...]
        h1_ref[...] = jnp.maximum(h1, 0.0).astype(wt)
        acc_ref[...] = jnp.zeros_like(acc_ref)

    h2 = (jnp.dot(a_ref[...], w2a_ref[...], preferred_element_type=jnp.float32)
          + jnp.dot(h1_ref[...], w2x_ref[...], preferred_element_type=jnp.float32)
          + b2_ref[...])
    h2 = jnp.maximum(h2, 0.0).astype(wt)
    acc_ref[...] += jnp.dot(h2, w3_ref[...], preferred_element_type=jnp.float32)

    @pl.when(k == pl.num_programs(1) - 1)
    def _():
        out_ref[...] = acc_ref[...] + b3_ref[...]


# ---------------------------------------------------------------------------
# One-time parameter preparation (hoisted out of the per-call path).
# ---------------------------------------------------------------------------
def prepare_params(params, num_states, num_actions, weight_dtype=jnp.bfloat16):
    S, A = num_states, num_actions
    H1, H2, O = 4 * S, 4 * (S + A), S + 1
    # Lane-pad both output dims (dense stores) and contraction dims (unmasked
    # x/a loads, no sub-sublane bf16 weight tiles).
    Sp, Ap = _round_up(S, 128), _round_up(A, 128)
    H1p, H2p, Op = _round_up(H1, 128), _round_up(H2, 128), _round_up(O, 128)

    w1, b1, w2, b2, w3, b3 = (params[k] for k in ("w1", "b1", "w2", "b2", "w3", "b3"))
    assert w1.shape == (S, H1), w1.shape
    assert w2.shape == (H1 + A, H2), "fc2 weight must match the cat([h1, a]) layout"
    assert w3.shape == (H2, O), w3.shape

    def padw(w, rows, cols):
        w = w.astype(jnp.float32)
        w = jnp.pad(w, ((0, rows - w.shape[0]), (0, cols - w.shape[1])))
        return w.astype(weight_dtype)

    def padb(b, cols):
        b = b.astype(jnp.float32)
        return jnp.pad(b, (0, cols - b.shape[0])).reshape(1, cols)

    return {
        "w1": padw(w1, Sp, H1p), "b1": padb(b1, H1p),
        "w2x": padw(w2[:H1, :], H1p, H2p),      # concat-free split, done once
        "w2a": padw(w2[H1:, :], Ap, H2p),
        "b2": padb(b2, H2p),
        "w3": padw(w3, H2p, Op), "b3": padb(b3, Op),
        "dims": dict(S=S, A=A, H1=H1, H2=H2, O=O,
                     Sp=Sp, Ap=Ap, H1p=H1p, H2p=H2p, Op=Op),
    }


# ---------------------------------------------------------------------------
# Forward wrappers
# ---------------------------------------------------------------------------
def critic_forward_batched(xb, ab, prepared, *, force_tiled=False, tk=None):
    """xb: (B, S), ab: (B, A)  ->  (B, S + 1)."""
    d = prepared["dims"]
    S, A, O = d["S"], d["A"], d["O"]
    Sp, Ap, H1p, H2p, Op = d["Sp"], d["Ap"], d["H1p"], d["H2p"], d["Op"]
    B = xb.shape[0]
    assert xb.shape == (B, S) and ab.shape == (B, A)

    wt = prepared["w1"].dtype
    cap = _vmem_capacity_bytes()
    budget = min(cap - (8 << 20), int(0.85 * cap))        # generation-aware headroom
    max_tb = 512 if cap >= (96 << 20) else 256             # bigger tiles on 128-MiB parts

    single_buf = _single_buffer_params_supported()
    nbuf_params = 1 if single_buf else 2

    param_keys = ("w1", "b1", "w2x", "w2a", "b2", "w3", "b3")
    param_arrays = [prepared[k] for k in param_keys]
    param_bytes = sum(int(p.nbytes) for p in param_arrays)

    TB = min(_round_up(max(B, 1), 8), max_tb)

    def fused_need(tb):
        act = 2 * tb * (Sp + Ap) * 2 + 2 * tb * Op * 4          # double-buffered I/O blocks
        inter = tb * (H1p + H2p) * (4 + 2)                       # f32 pre-ReLU + bf16 post
        return nbuf_params * param_bytes + act + inter + (2 << 20)

    use_tiled = bool(force_tiled) or fused_need(TB) > budget
    if use_tiled and cap < (96 << 20):
        TB = min(TB, 128)                                        # v7x: smaller batch tile

    if use_tiled:
        if tk is not None:
            TK = int(tk)
        else:
            TK = 128
            for cand in (1024, 512, 256):
                if H2p % cand == 0:
                    TK = cand
                    break
        assert H2p % TK == 0 and TK % 128 == 0

    Bp = _round_up(max(B, 1), TB)

    # Stream activations as bf16 (half the per-step DMA bytes); pad batch/lane.
    xb = xb.astype(wt)
    ab = ab.astype(wt)
    if xb.shape != (Bp, Sp):
        xb = jnp.pad(xb, ((0, Bp - B), (0, Sp - S)))
    if ab.shape != (Bp, Ap):
        ab = jnp.pad(ab, ((0, Bp - B), (0, Ap - A)))

    if not use_tiled:
        grid = (Bp // TB,)
        in_specs = [pl.BlockSpec((TB, Sp), lambda i: (i, 0)),
                    pl.BlockSpec((TB, Ap), lambda i: (i, 0))]
        in_specs += [_param_spec(p.shape, 1, single_buf) for p in param_arrays]
        out_specs = pl.BlockSpec((TB, Op), lambda i: (i, 0))
        scratch_shapes = ()
        kernel = critic_kernel_fused
        dim_sem = ("parallel",)
        need = fused_need(TB)
    else:
        nk = H2p // TK
        grid = (Bp // TB, nk)
        in_specs = [
            pl.BlockSpec((TB, Sp), lambda i, k: (i, 0)),
            pl.BlockSpec((TB, Ap), lambda i, k: (i, 0)),
            _param_spec(prepared["w1"].shape, 2, single_buf),    # resident
            _param_spec(prepared["b1"].shape, 2, single_buf),    # resident
            pl.BlockSpec((H1p, TK), lambda i, k: (0, k)),        # streamed
            pl.BlockSpec((Ap, TK), lambda i, k: (0, k)),         # streamed
            pl.BlockSpec((1, TK), lambda i, k: (0, k)),          # streamed
            pl.BlockSpec((TK, Op), lambda i, k: (k, 0)),         # streamed
            _param_spec(prepared["b3"].shape, 2, single_buf),    # resident
        ]
        out_specs = pl.BlockSpec((TB, Op), lambda i, k: (i, 0))
        scratch_shapes = (pltpu.VMEM((TB, H1p), wt),             # h1 (bf16)
                          pltpu.VMEM((TB, Op), jnp.float32))     # fc3 accumulator
        kernel = critic_kernel_tiled
        dim_sem = ("parallel", "arbitrary")
        resident_bytes = sum(int(prepared[k].nbytes) for k in ("w1", "b1", "b3"))
        streamed_step = H1p * TK * 2 + Ap * TK * 2 + TK * 4 + TK * Op * 2
        need = (nbuf_params * resident_bytes + 2 * streamed_step
                + 2 * TB * (Sp + Ap) * 2 + 2 * TB * Op * 4
                + TB * H1p * 2 + TB * Op * 4
                + TB * (H1p + TK) * (4 + 2) + (2 << 20))

    # Advisory cost estimate.
    flops = 2 * Bp * (Sp * H1p + (Ap + H1p) * H2p + H2p * Op)
    cost = pl.CostEstimate(flops=int(flops), transcendentals=0,
                           bytes_accessed=int(param_bytes + Bp * (Sp + Ap) * 2 + Bp * Op * 4))

    cp_kwargs = dict(dimension_semantics=dim_sem)
    if need > (16 << 20):   # only raise the scoped-VMEM limit when defaults would bind
        cp_kwargs["vmem_limit_bytes"] = int(min(max(need, 32 << 20), budget))

    out = pl.pallas_call(
        kernel,
        out_shape=jax.ShapeDtypeStruct((Bp, Op), jnp.float32),
        grid=grid,
        in_specs=in_specs,
        out_specs=out_specs,
        scratch_shapes=scratch_shapes,
        compiler_params=pltpu.CompilerParams(**cp_kwargs),
        cost_estimate=cost,
    )(xb, ab, *param_arrays)
    return out[:B, :O]


def critic_forward(x, a, prepared):
    """Module-faithful single-vector forward: x (S,), a (A,) -> (S + 1,)."""
    return critic_forward_batched(x[None, :], a[None, :], prepared)[0]


# ---------------------------------------------------------------------------
# Init + references
# ---------------------------------------------------------------------------
def init_params(key, num_states, num_actions):
    """Deterministic synthetic parameters, shapes as in Critic.__init__.
    Weights are stored transposed (in, out) relative to nn.Linear's (out, in)."""
    S, A = num_states, num_actions
    H1, H2, O = 4 * S, 4 * (S + A), S + 1
    ks = jax.random.split(key, 6)
    scale = 0.05
    return {
        "w1": scale * jax.random.normal(ks[0], (S, H1), jnp.float32),
        "b1": scale * jax.random.normal(ks[1], (H1,), jnp.float32),
        "w2": scale * jax.random.normal(ks[2], (H1 + A, H2), jnp.float32),
        "b2": scale * jax.random.normal(ks[3], (H2,), jnp.float32),
        "w3": scale * jax.random.normal(ks[4], (H2, O), jnp.float32),
        "b3": scale * jax.random.normal(ks[5], (O,), jnp.float32),
    }


def critic_reference(x, a, params):
    """Pure-JAX float32 reference of the PyTorch module math (single vector)."""
    h1 = jnp.maximum(x @ params["w1"] + params["b1"], 0.0)
    h2 = jnp.maximum(jnp.concatenate([h1, a]) @ params["w2"] + params["b2"], 0.0)
    return h2 @ params["w3"] + params["b3"]


def critic_reference_prepared(xb, ab, prepared):
    """Batched reference mirroring the kernel math (bf16 weights/acts, f32 acc)."""
    d = prepared["dims"]
    wt = prepared["w1"].dtype
    f32 = jnp.float32
    xp = jnp.pad(xb.astype(wt), ((0, 0), (0, d["Sp"] - xb.shape[1])))
    ap = jnp.pad(ab.astype(wt), ((0, 0), (0, d["Ap"] - ab.shape[1])))
    h2 = jnp.dot(ap, prepared["w2a"], preferred_element_type=f32) + prepared["b2"]
    h1 = jnp.dot(xp, prepared["w1"], preferred_element_type=f32) + prepared["b1"]
    h1 = jnp.maximum(h1, 0.0).astype(wt)
    h2 = jnp.maximum(h2 + jnp.dot(h1, prepared["w2x"], preferred_element_type=f32), 0.0).astype(wt)
    out = jnp.dot(h2, prepared["w3"], preferred_element_type=f32) + prepared["b3"]
    return out[:, :d["O"]]


if __name__ == "__main__":
    num_states = 32
    num_actions = 8
    batch = 8  # small, sublane-aligned demo batch

    key = jax.random.PRNGKey(0)
    kx, ka, kp = jax.random.split(key, 3)
    xb = jax.random.normal(kx, (batch, num_states), jnp.float32)
    ab = jax.random.normal(ka, (batch, num_actions), jnp.float32)

    raw_params = init_params(kp, num_states, num_actions)
    prepared = prepare_params(raw_params, num_states, num_actions)  # one-time prep

    # Fast path: whole-weight-resident fused kernel.
    fwd = jax.jit(functools.partial(critic_forward_batched, prepared=prepared))
    out = jax.block_until_ready(fwd(xb, ab))
    assert out.shape == (batch, num_states + 1), out.shape

    # Exact-math reference (same bf16 weights/activations, f32 accumulation).
    ref_bf16 = critic_reference_prepared(xb, ab, prepared)
    assert jnp.allclose(out, ref_bf16, atol=2e-3, rtol=2e-3), \
        float(jnp.max(jnp.abs(out - ref_bf16)))

    # Module-faithful float32 reference (bf16 adds ~1e-3-level error).
    ref_f32 = jax.vmap(lambda xi, ai: critic_reference(xi, ai, raw_params))(xb, ab)
    assert jnp.allclose(out, ref_f32, atol=3e-2, rtol=3e-2), \
        float(jnp.max(jnp.abs(out - ref_f32)))

    # Large-S / v7x path: H2-tiled reduction kernel, exercised here at small
    # shapes with TK=128 so the accumulator runs over 2 reduction steps.
    out_tiled = jax.block_until_ready(
        critic_forward_batched(xb, ab, prepared, force_tiled=True, tk=128))
    assert out_tiled.shape == out.shape, out_tiled.shape
    assert jnp.allclose(out_tiled, ref_bf16, atol=2e-3, rtol=2e-3), \
        float(jnp.max(jnp.abs(out_tiled - ref_bf16)))

    # Single-vector path (original module semantics) agrees with row 0.
    out1 = jax.block_until_ready(critic_forward(xb[0], ab[0], prepared))
    assert out1.shape == (num_states + 1,), out1.shape
    assert jnp.allclose(out1, out[0], atol=1e-5, rtol=1e-5)

    print("KERNEL_OK")
</pallas_src>

<mosaic_0001>
module attributes {stable_mosaic.version = 11 : i64} {
  func.func @critic_kernel_fused(%arg0: i32, %arg1: memref<8x128xbf16, #tpu.memory_space<vmem>>, %arg2: memref<8x128xbf16, #tpu.memory_space<vmem>>, %arg3: memref<128x128xbf16, #tpu.memory_space<vmem>>, %arg4: memref<1x128xf32, #tpu.memory_space<vmem>>, %arg5: memref<128x256xbf16, #tpu.memory_space<vmem>>, %arg6: memref<128x256xbf16, #tpu.memory_space<vmem>>, %arg7: memref<1x256xf32, #tpu.memory_space<vmem>>, %arg8: memref<256x128xbf16, #tpu.memory_space<vmem>>, %arg9: memref<1x128xf32, #tpu.memory_space<vmem>>, %arg10: memref<8x128xf32, #tpu.memory_space<vmem>>) attributes {dimension_semantics = [#tpu.dimension_semantics<parallel>], iteration_bounds = array<i64: 1>, scalar_prefetch = 0 : i64, scratch_operands = 0 : i64, tpu.core_type = #tpu.core_type<tc>, window_params = [{transform_indices = @transform_0, window_bounds = array<i64: 8, 128>}, {transform_indices = @transform_1, window_bounds = array<i64: 8, 128>}, {pipeline_mode = #tpu.pipeline_mode<synchronous>, transform_indices = @transform_2, window_bounds = array<i64: 128, 128>}, {pipeline_mode = #tpu.pipeline_mode<synchronous>, transform_indices = @transform_3, window_bounds = array<i64: 1, 128>}, {pipeline_mode = #tpu.pipeline_mode<synchronous>, transform_indices = @transform_4, window_bounds = array<i64: 128, 256>}, {pipeline_mode = #tpu.pipeline_mode<synchronous>, transform_indices = @transform_5, window_bounds = array<i64: 128, 256>}, {pipeline_mode = #tpu.pipeline_mode<synchronous>, transform_indices = @transform_6, window_bounds = array<i64: 1, 256>}, {pipeline_mode = #tpu.pipeline_mode<synchronous>, transform_indices = @transform_7, window_bounds = array<i64: 256, 128>}, {pipeline_mode = #tpu.pipeline_mode<synchronous>, transform_indices = @transform_8, window_bounds = array<i64: 1, 128>}, {transform_indices = @transform_9, window_bounds = array<i64: 8, 128>}]} {
    %c0 = arith.constant 0 : index
    %c0_0 = arith.constant 0 : index
    %0 = vector.load %arg2[%c0, %c0_0] : memref<8x128xbf16, #tpu.memory_space<vmem>>, vector<8x128xbf16>
    %c0_1 = arith.constant 0 : index
    %c0_2 = arith.constant 0 : index
    %1 = vector.load %arg6[%c0_1, %c0_2] : memref<128x256xbf16, #tpu.memory_space<vmem>>, vector<128x256xbf16>
    %cst = arith.constant dense<0.000000e+00> : vector<8x256xf32>
    %2 = tpu.matmul %0, %1, %cst {dimension_numbers = #tpu.dot_dimension_numbers<[1], [0], [0], [1], [0, 0, 1, 1], [], []>} : vector<8x128xbf16>, vector<128x256xbf16>, vector<8x256xf32> -> vector<8x256xf32>
    %c0_3 = arith.constant 0 : index
    %c0_4 = arith.constant 0 : index
    %3 = vector.load %arg7[%c0_3, %c0_4] : memref<1x256xf32, #tpu.memory_space<vmem>>, vector<1x256xf32>
    %4 = vector.broadcast %3 : vector<1x256xf32> to vector<8x256xf32>
    %5 = arith.addf %2, %4 : vector<8x256xf32>
    %c0_5 = arith.constant 0 : index
    %c0_6 = arith.constant 0 : index
    %6 = vector.load %arg1[%c0_5, %c0_6] : memref<8x128xbf16, #tpu.memory_space<vmem>>, vector<8x128xbf16>
    %c0_7 = arith.constant 0 : index
    %c0_8 = arith.constant 0 : index
    %7 = vector.load %arg3[%c0_7, %c0_8] : memref<128x128xbf16, #tpu.memory_space<vmem>>, vector<128x128xbf16>
    %cst_9 = arith.constant dense<0.000000e+00> : vector<8x128xf32>
    %8 = tpu.matmul %6, %7, %cst_9 {dimension_numbers = #tpu.dot_dimension_numbers<[1], [0], [0], [1], [0, 0, 1, 1], [], []>} : vector<8x128xbf16>, vector<128x128xbf16>, vector<8x128xf32> -> vector<8x128xf32>
    %c0_10 = arith.constant 0 : index
    %c0_11 = arith.constant 0 : index
    %9 = vector.load %arg4[%c0_10, %c0_11] : memref<1x128xf32, #tpu.memory_space<vmem>>, vector<1x128xf32>
    %10 = vector.broadcast %9 : vector<1x128xf32> to vector<8x128xf32>
    %11 = arith.addf %8, %10 : vector<8x128xf32>
    %cst_12 = arith.constant 0.000000e+00 : f32
    %12 = vector.broadcast %cst_12 : f32 to vector<8x128xf32>
    %13 = arith.maximumf %11, %12 : vector<8x128xf32>
    %14 = arith.truncf %13 : vector<8x128xf32> to vector<8x128xbf16>
    %c0_13 = arith.constant 0 : index
    %c0_14 = arith.constant 0 : index
    %15 = vector.load %arg5[%c0_13, %c0_14] : memref<128x256xbf16, #tpu.memory_space<vmem>>, vector<128x256xbf16>
    %cst_15 = arith.constant dense<0.000000e+00> : vector<8x256xf32>
    %16 = tpu.matmul %14, %15, %cst_15 {dimension_numbers = #tpu.dot_dimension_numbers<[1], [0], [0], [1], [0, 0, 1, 1], [], []>} : vector<8x128xbf16>, vector<128x256xbf16>, vector<8x256xf32> -> vector<8x256xf32>
    %17 = arith.addf %5, %16 : vector<8x256xf32>
    %cst_16 = arith.constant 0.000000e+00 : f32
    %18 = vector.broadcast %cst_16 : f32 to vector<8x256xf32>
    %19 = arith.maximumf %17, %18 : vector<8x256xf32>
    %20 = arith.truncf %19 : vector<8x256xf32> to vector<8x256xbf16>
    %c0_17 = arith.constant 0 : index
    %c0_18 = arith.constant 0 : index
    %21 = vector.load %arg8[%c0_17, %c0_18] : memref<256x128xbf16, #tpu.memory_space<vmem>>, vector<256x128xbf16>
    %cst_19 = arith.constant dense<0.000000e+00> : vector<8x128xf32>
    %22 = tpu.matmul %20, %21, %cst_19 {dimension_numbers = #tpu.dot_dimension_numbers<[1], [0], [0], [1], [0, 0, 1, 1], [], []>} : vector<8x256xbf16>, vector<256x128xbf16>, vector<8x128xf32> -> vector<8x128xf32>
    %c0_20 = arith.constant 0 : index
    %c0_21 = arith.constant 0 : index
    %23 = vector.load %arg9[%c0_20, %c0_21] : memref<1x128xf32, #tpu.memory_space<vmem>>, vector<1x128xf32>
    %24 = vector.broadcast %23 : vector<1x128xf32> to vector<8x128xf32>
    %25 = arith.addf %22, %24 : vector<8x128xf32>
    %c0_22 = arith.constant 0 : index
    %c0_23 = arith.constant 0 : index
    %26 = vector.load %arg10[%c0_22, %c0_23] : memref<8x128xf32, #tpu.memory_space<vmem>>, vector<8x128xf32>
    tpu.vector_store %arg10[%c0_22, %c0_23], %25 {strides = array<i32>} : memref<8x128xf32, #tpu.memory_space<vmem>>, vector<8x128xf32>,
    return
  }
  func.func @transform_0(%arg0: i32) -> (i32, i32) {
    %c0_i32 = arith.constant 0 : i32
    %c0_i32_0 = arith.constant 0 : i32
    return %arg0, %c0_i32 : i32, i32
  }
  func.func @transform_1(%arg0: i32) -> (i32, i32) {
    %c0_i32 = arith.constant 0 : i32
    %c0_i32_0 = arith.constant 0 : i32
    return %arg0, %c0_i32 : i32, i32
  }
  func.func @transform_2(%arg0: i32) -> (i32, i32) {
    %c0_i32 = arith.constant 0 : i32
    %c0_i32_0 = arith.constant 0 : i32
    %c0_i32_1 = arith.constant 0 : i32
    return %c0_i32, %c0_i32_0 : i32, i32
  }
  func.func @transform_3(%arg0: i32) -> (i32, i32) {
    %c0_i32 = arith.constant 0 : i32
    %c0_i32_0 = arith.constant 0 : i32
    %c0_i32_1 = arith.constant 0 : i32
    return %c0_i32, %c0_i32_0 : i32, i32
  }
  func.func @transform_4(%arg0: i32) -> (i32, i32) {
    %c0_i32 = arith.constant 0 : i32
    %c0_i32_0 = arith.constant 0 : i32
    %c0_i32_1 = arith.constant 0 : i32
    return %c0_i32, %c0_i32_0 : i32, i32
  }
  func.func @transform_5(%arg0: i32) -> (i32, i32) {
    %c0_i32 = arith.constant 0 : i32
    %c0_i32_0 = arith.constant 0 : i32
    %c0_i32_1 = arith.constant 0 : i32
    return %c0_i32, %c0_i32_0 : i32, i32
  }
  func.func @transform_6(%arg0: i32) -> (i32, i32) {
    %c0_i32 = arith.constant 0 : i32
    %c0_i32_0 = arith.constant 0 : i32
    %c0_i32_1 = arith.constant 0 : i32
    return %c0_i32, %c0_i32_0 : i32, i32
  }
  func.func @transform_7(%arg0: i32) -> (i32, i32) {
    %c0_i32 = arith.constant 0 : i32
    %c0_i32_0 = arith.constant 0 : i32
    %c0_i32_1 = arith.constant 0 : i32
    return %c0_i32, %c0_i32_0 : i32, i32
  }
  func.func @transform_8(%arg0: i32) -> (i32, i32) {
    %c0_i32 = arith.constant 0 : i32
    %c0_i32_0 = arith.constant 0 : i32
    %c0_i32_1 = arith.constant 0 : i32
    return %c0_i32, %c0_i32_0 : i32, i32
  }
  func.func @transform_9(%arg0: i32) -> (i32, i32) {
    %c0_i32 = arith.constant 0 : i32
    %c0_i32_0 = arith.constant 0 : i32
    return %arg0, %c0_i32 : i32, i32
  }
}

</mosaic_0001>

<bundles_post_ra>
// kernel: critic_forward_batched.1
= control target key start
LH: loop header
LB: loop body
LE: loop exit
PB: predicated region body
PF: predicated region fallthrough
CT: control target
= control target key end

     0   :  { %14 = vsyncpa [#allocation3], 0  ;;  %s1123_s0 = inlined_call_operand.vmem [shape: bf16[8,128], index: 0, kind: input, shape index: {}]   ;;  %s1124_s1 = inlined_call_operand.vmem [shape: bf16[8,128], index: 1, kind: input, shape index: {}]   ;;  %s1125_s2 = inlined_call_operand.hbm [shape: bf16[128,128], index: 2, kind: input, shape index: {}]   ;;  %s1126_s3 = inlined_call_operand.vmem [shape: f32[1,128], index: 3, kind: input, shape index: {}]   ;;  %s1127_s4 = inlined_call_operand.hbm [shape: bf16[128,256], index: 4, kind: input, shape index: {}]   ;;  %s1128_s5 = inlined_call_operand.hbm [shape: bf16[128,256], index: 5, kind: input, shape index: {}]   ;;  %s1129_s6 = inlined_call_operand.vmem [shape: f32[1,256], index: 6, kind: input, shape index: {}]   ;;  %s1130_s7 = inlined_call_operand.hbm [shape: bf16[256,128], index: 7, kind: input, shape index: {}]   ;;  %s1131_s8 = inlined_call_operand.vmem [shape: f32[1,128], index: 8, kind: input, shape index: {}]   ;;  %s1132_s9 = inlined_call_operand.hbm [shape: f32[8,128], index: 9, kind: output, shape index: {}]  }
   0x1   :  { %15 = vsyncpa [#allocation6], 0 }
   0x2   :  { %16 = vsyncpa [#allocation9], 0  ;;  %s41_s11 = sshll.u32 %s1127_s4, 4  ;;  %s42_s11 = int_to_ptr.hbm [resolvable:$true] %s41_s11 }
   0x3   :  { %17 = vsyncpa [#allocation4], 0  ;;  %s1034_s12 = smov [#allocation5]   ;;  %s26_s16 = sshll.u32 %s1125_s2, 4  ;;  %s27_s16 = int_to_ptr.hbm [resolvable:$true] %s26_s16 }
   0x4   :  { %s43_s13 = sshll.u32 %s1034_s12, 4  ;;  %s1035_s17 = smov 128   ;;  %s44_s13 = int_to_ptr.vmem [resolvable:$true] %s43_s13 }
   0x5   :  { %s1036_s18 = smov 8   ;;  %s1037_s19 = smov [#allocation2]  }
   0x6   :  { %49 = dma.hbm_to_vmem [thread:$0]  %s42_s11, 2048, %s44_s13, [#allocation6], %s1035_s17, %s1035_s17, %s1036_s18  }
   0x7   :  { %s28_s20 = sshll.u32 %s1037_s19, 4  ;;  %s1038_s21 = smov 64   ;;  %s29_s20 = int_to_ptr.vmem [resolvable:$true] %s28_s20 }
   0x8   :  { %s1039_s22 = smov 4   ;;  %s54_s24 = sshll.u32 %s1128_s5, 4  ;;  %s55_s24 = int_to_ptr.hbm [resolvable:$true] %s54_s24 }
   0x9   :  { %34 = dma.hbm_to_vmem [thread:$0]  %s27_s16, 1024, %s29_s20, [#allocation3], %s1038_s21, %s1038_s21, %s1039_s22  }
   0xa   :  { %s1040_s25 = smov [#allocation7]   ;;  %s69_s28 = sshll.u32 %s1130_s7, 4  ;;  %s70_s28 = int_to_ptr.hbm [resolvable:$true] %s69_s28 }
   0xb   :  { %s56_s26 = sshll.u32 %s1040_s25, 4  ;;  %s1041_s29 = smov [#allocation8]   ;;  %s57_s26 = int_to_ptr.vmem [resolvable:$true] %s56_s26 }
   0xc   :  { %62 = dma.hbm_to_vmem [thread:$0]  %s55_s24, 2048, %s57_s26, [#allocation6], %s1035_s17, %s1035_s17, %s1036_s18  }
   0xd   :  { %s71_s30 = sshll.u32 %s1041_s29, 4  ;;  %s72_s30 = int_to_ptr.vmem [resolvable:$true] %s71_s30 }
   0xe   :  { %77 = dma.hbm_to_vmem [thread:$0]  %s70_s28, 2048, %s72_s30, [#allocation9], %s1038_s21, %s1038_s21, %s1039_s22  }
   0xf   :  { %1026 = dma.done.wait [#allocation3], 1024  }
  0x10   :  { %1027 = vsyncadd [#allocation3], 4294966272 }
  0x11   :  { %1028 = dma.done.wait [#allocation6], 4096  }
  0x12   :  { %1029 = vsyncadd [#allocation6], 4294963200 }
  0x13   :  { %1030 = dma.done.wait [#allocation9], 2048  }
  0x14   :  { %1031 = vsyncadd [#allocation9], 4294965248  ;;  %v862_v0 = vld [vmem:[#allocation2 + $0x38] sm:$0xff]  ;;  %v861_v1 = vld [vmem:[#allocation2 + $0x30] sm:$0xff]  ;;  %s603_s18 = sshll.u32 %s1132_s9, 4  ;;  %s604_s18 = int_to_ptr.hbm [resolvable:$true] %s603_s18 }
  0x15   :  { %294 = vmatpush.bf16.msra.mxu2 %v862_v0  ;;  %v673_v2 = vld [vmem:[#allocation7 + $0x70] sm:$0xf]  ;;  %v854_v3 = vld [vmem:[#allocation7 + $0x74] sm:$0xf0]  ;;  %v665_v4 = vld [vmem:[#allocation7 + $0x60] sm:$0xf] }
  0x16   :  { %v674_v5 = vor.u32 %v854_v3, %v673_v2  ;;  %v852_v6 = vld [vmem:[#allocation7 + $0x64] sm:$0xf0]  ;;  %v853_v9 = vld [vmem:[#allocation7 + $0x74] sm:$0xf]  ;;  %v675_v10 = vld [vmem:[#allocation7 + $0x78] sm:$0xf0] }
  0x17   :  { %v860_v7 = vld [vmem:[#allocation2 + $0x28] sm:$0xff]  ;;  %v666_v8 = vor.u32 %v852_v6, %v665_v4  ;;  %v657_v11 = vld [vmem:[#allocation7 + $0x50] sm:$0xf]  ;;  %v850_v12 = vld [vmem:[#allocation7 + $0x54] sm:$0xf0]  ;;  %v678_v13 = vor.u32 %v853_v9, %v675_v10 }
  0x18   :  { %199 = vmatpush.bf16.msra.mxu0 %v674_v5  ;;  %v851_v14 = vld [vmem:[#allocation7 + $0x64] sm:$0xf]  ;;  %v667_v15 = vld [vmem:[#allocation7 + $0x68] sm:$0xf0]  ;;  %v849_v18 = vld [vmem:[#allocation7 + $0x54] sm:$0xf]  ;;  %v658_v19 = vor.u32 %v850_v12, %v657_v11 }
  0x19   :  { %295 = vmatpush.bf16.msra.mxu2 %v861_v1  ;;  %v859_v16 = vld [vmem:[#allocation2 + $0x20] sm:$0xff]  ;;  %212 = vmatpush.bf16.msra.mxu1 %v678_v13  ;;  %v670_v17 = vor.u32 %v851_v14, %v667_v15  ;;  %v659_v20 = vld [vmem:[#allocation7 + $0x58] sm:$0xf0]  ;;  %v769_v21 = vld [vmem:[#allocation5 + $0x70] sm:$0xf] }
  0x1a   :  { %v878_v22 = vld [vmem:[#allocation5 + $0x74] sm:$0xf0]  ;;  %v649_v23 = vld [vmem:[#allocation7 + $0x40] sm:$0xf]  ;;  %v848_v24 = vld [vmem:[#allocation7 + $0x44] sm:$0xf0]  ;;  %v662_v29 = vor.u32 %v849_v18, %v659_v20 }
  0x1b   :  { %v770_v25 = vor.u32 %v878_v22, %v769_v21  ;;  %v761_v26 = vld [vmem:[#allocation5 + $0x60] sm:$0xf]  ;;  %v876_v27 = vld [vmem:[#allocation5 + $0x64] sm:$0xf0]  ;;  %v858_v28 = vld [vmem:[#allocation2 + $0x18] sm:$0xff]  ;;  %v650_v31 = vor.u32 %v848_v24, %v649_v23 }
  0x1c   :  { %200 = vmatpush.bf16.msra.mxu0 %v666_v8  ;;  %v762_v30 = vor.u32 %v876_v27, %v761_v26  ;;  %v847_v32 = vld [vmem:[#allocation7 + $0x44] sm:$0xf]  ;;  %v651_v33 = vld [vmem:[#allocation7 + $0x48] sm:$0xf0]  ;;  %v753_v34 = vld [vmem:[#allocation5 + $0x50] sm:$0xf] }
  0x1d   :  { %296 = vmatpush.bf16.msra.mxu2 %v860_v7  ;;  %213 = vmatpush.bf16.msra.mxu1 %v670_v17  ;;  %v641_v35 = vld [vmem:[#allocation7 + $0x30] sm:$0xf]  ;;  %v846_v36 = vld [vmem:[#allocation7 + $0x34] sm:$0xf0]  ;;  %v654_v39 = vor.u32 %v847_v32, %v651_v33  ;;  %v845_v40 = vld [vmem:[#allocation7 + $0x34] sm:$0xf] }
  0x1e   :  { %405 = vmatpush.bf16.msra.mxu3 %v770_v25  ;;  %v874_v37 = vld [vmem:[#allocation5 + $0x54] sm:$0xf0]  ;;  %v857_v38 = vld [vmem:[#allocation2 + $0x10] sm:$0xff]  ;;  %v642_v42 = vor.u32 %v846_v36, %v641_v35  ;;  %v643_v43 = vld [vmem:[#allocation7 + $0x38] sm:$0xf0] }
  0x1f   :  { %v754_v41 = vor.u32 %v874_v37, %v753_v34  ;;  %v745_v44 = vld [vmem:[#allocation5 + $0x40] sm:$0xf]  ;;  %v872_v45 = vld [vmem:[#allocation5 + $0x44] sm:$0xf0]  ;;  %v646_v49 = vor.u32 %v845_v40, %v643_v43  ;;  %v843_v50 = vld [vmem:[#allocation7 + $0x24] sm:$0xf] }
  0x20   :  { %201 = vmatpush.bf16.msra.mxu0 %v658_v19  ;;  %v633_v46 = vld [vmem:[#allocation7 + $0x20] sm:$0xf]  ;;  %v844_v47 = vld [vmem:[#allocation7 + $0x24] sm:$0xf0]  ;;  %v635_v51 = vld [vmem:[#allocation7 + $0x28] sm:$0xf0]  ;;  %v746_v52 = vor.u32 %v872_v45, %v745_v44 }
  0x21   :  { %297 = vmatpush.bf16.msra.mxu2 %v859_v16  ;;  %214 = vmatpush.bf16.msra.mxu1 %v662_v29  ;;  %v856_v48 = vld [vmem:[#allocation2 + $0x8] sm:$0xff]  ;;  %v737_v53 = vld [vmem:[#allocation5 + $0x30] sm:$0xf]  ;;  %v634_v54 = vor.u32 %v844_v47, %v633_v46  ;;  %v870_v55 = vld [vmem:[#allocation5 + $0x34] sm:$0xf0]  ;;  %v638_v59 = vor.u32 %v843_v50, %v635_v51 }
  0x22   :  { %406 = vmatpush.bf16.msra.mxu3 %v762_v30  ;;  %v625_v56 = vld [vmem:[#allocation7 + $0x10] sm:$0xf]  ;;  %v842_v57 = vld [vmem:[#allocation7 + $0x14] sm:$0xf0]  ;;  %v855_v58 = vld [vmem:[#allocation2] sm:$0xff]  ;;  %v738_v60 = vor.u32 %v870_v55, %v737_v53 }
  0x23   :  { %v626_v61 = vor.u32 %v842_v57, %v625_v56  ;;  %v617_v62 = vld [vmem:[#allocation7] sm:$0xf]  ;;  %v841_v63 = vld [vmem:[#allocation7 + $0x14] sm:$0xf]  ;;  %v627_v0 = vld [vmem:[#allocation7 + $0x18] sm:$0xf0] }
  0x24   :  { %202 = vmatpush.bf16.msra.mxu0 %v650_v31  ;;  %v840_v1 = vld [vmem:[#allocation7 + $0x4] sm:$0xf0]  ;;  %v729_v2 = vld [vmem:[#allocation5 + $0x20] sm:$0xf]  ;;  %v877_v4 = vld [vmem:[#allocation5 + $0x74] sm:$0xf]  ;;  %v630_v6 = vor.u32 %v841_v63, %v627_v0 }
  0x25   :  { %298 = vmatpush.bf16.msra.mxu2 %v858_v28  ;;  %215 = vmatpush.bf16.msra.mxu1 %v654_v39  ;;  %v868_v3 = vld [vmem:[#allocation5 + $0x24] sm:$0xf0]  ;;  %v771_v5 = vld [vmem:[#allocation5 + $0x78] sm:$0xf0]  ;;  %v225_v7 = vld [vmem:[%s1123_s0] sm:$0xf]  ;;  %v618_v8 = vor.u32 %v840_v1, %v617_v62 }
  0x26   :  { %407 = vmatpush.bf16.msra.mxu3 %v754_v41  ;;  %v839_v9 = vld [vmem:[#allocation7 + $0x4] sm:$0xf]  ;;  %v619_v10 = vld [vmem:[#allocation7 + $0x8] sm:$0xf0]  ;;  %v730_v11 = vor.u32 %v868_v3, %v729_v2  ;;  %v774_v12 = vor.u32 %v877_v4, %v771_v5  ;;  %v96_v16 = vld [vmem:[%s1124_s1] sm:$0xf] }
  0x27   :  { %v875_v13 = vld [vmem:[#allocation5 + $0x64] sm:$0xf]  ;;  %v763_v14 = vld [vmem:[#allocation5 + $0x68] sm:$0xf0]  ;;  %v622_v15 = vor.u32 %v839_v9, %v619_v10  ;;  %v873_v18 = vld [vmem:[#allocation5 + $0x54] sm:$0xf] }
  0x28   :  { %203 = vmatpush.bf16.msra.mxu0 %v642_v42  ;;  %v766_v17 = vor.u32 %v875_v13, %v763_v14  ;;  %v755_v19 = vld [vmem:[#allocation5 + $0x58] sm:$0xf0]  ;;  %v871_v21 = vld [vmem:[#allocation5 + $0x44] sm:$0xf]  ;;  %v747_v22 = vld [vmem:[#allocation5 + $0x48] sm:$0xf0] }
  0x29   :  { %299 = vmatpush.bf16.msra.mxu2 %v857_v38  ;;  %216 = vmatpush.bf16.msra.mxu1 %v646_v49  ;;  %v758_v20 = vor.u32 %v873_v18, %v755_v19  ;;  %v750_v23 = vor.u32 %v871_v21, %v747_v22  ;;  %v869_v24 = vld [vmem:[#allocation5 + $0x34] sm:$0xf]  ;;  %v739_v25 = vld [vmem:[#allocation5 + $0x38] sm:$0xf0]  ;;  %v867_v27 = vld [vmem:[#allocation5 + $0x24] sm:$0xf] }
  0x2a   :  { %408 = vmatpush.bf16.msra.mxu3 %v746_v52  ;;  %v742_v26 = vor.u32 %v869_v24, %v739_v25  ;;  %v731_v28 = vld [vmem:[#allocation5 + $0x28] sm:$0xf0]  ;;  %v721_v30 = vld [vmem:[#allocation5 + $0x10] sm:$0xf]  ;;  %v866_v31 = vld [vmem:[#allocation5 + $0x14] sm:$0xf0] }
  0x2b   :  { %v734_v29 = vor.u32 %v867_v27, %v731_v28  ;;  %v865_v32 = vld [vmem:[#allocation5 + $0x14] sm:$0xf]  ;;  %v722_v33 = vor.u32 %v866_v31, %v721_v30  ;;  %v723_v34 = vld [vmem:[#allocation5 + $0x18] sm:$0xf0]  ;;  %v713_v36 = vld [vmem:[#allocation5] sm:$0xf] }
  0x2c   :  { %204 = vmatpush.bf16.msra.mxu0 %v634_v54  ;;  %v726_v35 = vor.u32 %v865_v32, %v723_v34  ;;  %v864_v37 = vld [vmem:[#allocation5 + $0x4] sm:$0xf0]  ;;  %v863_v38 = vld [vmem:[#allocation5 + $0x4] sm:$0xf]  ;;  %v715_v40 = vld [vmem:[#allocation5 + $0x8] sm:$0xf0] }
  0x2d   :  { %300 = vmatpush.bf16.msra.mxu2 %v856_v48  ;;  %217 = vmatpush.bf16.msra.mxu1 %v638_v59  ;;  %v714_v39 = vor.u32 %v864_v37, %v713_v36  ;;  %v718_v41 = vor.u32 %v863_v38, %v715_v40  ;;  %v894_v42 = vld [vmem:[#allocation8 + $0x78] sm:$0xff]  ;;  %v893_v44 = vld [vmem:[#allocation8 + $0x70] sm:$0xff]  ;;  %v892_v46 = vld [vmem:[#allocation8 + $0x68] sm:$0xff] }
  0x2e   :  { %409 = vmatpush.bf16.msra.mxu3 %v738_v60  ;;  %v886_v43 = vld [vmem:[#allocation8 + $0x38] sm:$0xff]  ;;  %v885_v45 = vld [vmem:[#allocation8 + $0x30] sm:$0xff]  ;;  %v884_v47 = vld [vmem:[#allocation8 + $0x28] sm:$0xff] }
  0x2f   :  { %v891_v48 = vld [vmem:[#allocation8 + $0x60] sm:$0xff]  ;;  %v890_v50 = vld [vmem:[#allocation8 + $0x58] sm:$0xff]  ;;  %v889_v52 = vld [vmem:[#allocation8 + $0x50] sm:$0xff] }
  0x30   :  { %205 = vmatpush.bf16.msra.mxu0 %v626_v61  ;;  %v883_v49 = vld [vmem:[#allocation8 + $0x20] sm:$0xff]  ;;  %v882_v51 = vld [vmem:[#allocation8 + $0x18] sm:$0xff]  ;;  %v888_v63 = vld [vmem:[#allocation8 + $0x48] sm:$0xff] }
  0x31   :  { %301 = vmatpush.bf16.msra.mxu2 %v855_v58  ;;  %218 = vmatpush.bf16.msra.mxu1 %v630_v6  ;;  %v904_v53 = vld [vmem:[%s1126_s3] ss:$0 sm:$0xff]  ;;  %v881_v0 = vld [vmem:[#allocation8 + $0x10] sm:$0xff]  ;;  %v880_v2 = vld [vmem:[#allocation8 + $0x8] sm:$0xff] }
  0x32   :  { %410 = vmatpush.bf16.msra.mxu3 %v730_v11  ;;  %v887_v1 = vld [vmem:[#allocation8 + $0x40] sm:$0xff] }
  0x33   :  { %v879_v3 = vld [vmem:[#allocation8] sm:$0xff] }
  0x34   :  { %302 = vmatmul.bf16.vlgmr.msra.gmra.mxu2 %v225_v7  ;;  %206 = vmatpush.bf16.msra.mxu0 %v618_v8  ;;  %v113_v4 = vld [vmem:[%s1129_s6] sm:$0x3]  ;;  %s1042_s6 = smov [#allocation10]  }
  0x35   :  { %219 = vmatpush.bf16.msra.mxu1 %v622_v15  ;;  %582 = vmatpush.bf16.msrb.mxu2 %v894_v42  ;;  %v116_v5 = vperm.slane %v113_v4, 1  ;;  %v115_v8 = vperm.slane %v113_v4, 0  ;;  %v905_v19 = vld [vmem:[%s1131_s8] ss:$0 sm:$0xff]  ;;  %s601_s15 = sshll.u32 %s1042_s6, 4  ;;  %s602_s15 = int_to_ptr.vmem [resolvable:$true] %s601_s15 }
  0x36   :  { %411 = vmatpush.bf16.msra.mxu3 %v722_v33 }
  0x37   :  { %207 = vmatmul.bf16.vlgmr.msra.gmra.mxu0 %v96_v16 }
  0x38   :  { %418 = vmatpush.bf16.msrb.mxu0 %v774_v12  ;;  %220 = vmatmul.bf16.vlgmr.msra.gmra.mxu1 %v96_v16 }
  0x39   :  { %569 = vmatpush.bf16.msrb.mxu1 %v886_v43  ;;  %583 = vmatpush.bf16.msrb.mxu2 %v893_v44 }
  0x3a   :  { %412 = vmatpush.bf16.msra.mxu3 %v714_v39 }
  0x3c   :  { %419 = vmatpush.bf16.msrb.mxu0 %v766_v17 }
  0x3d   :  { %570 = vmatpush.bf16.msrb.mxu1 %v885_v45  ;;  %584 = vmatpush.bf16.msrb.mxu2 %v892_v46 }
  0x40   :  { %420 = vmatpush.bf16.msrb.mxu0 %v758_v20 }
  0x41   :  { %571 = vmatpush.bf16.msrb.mxu1 %v884_v47  ;;  %585 = vmatpush.bf16.msrb.mxu2 %v891_v48 }
  0x44   :  { %421 = vmatpush.bf16.msrb.mxu0 %v750_v23 }
  0x45   :  { %572 = vmatpush.bf16.msrb.mxu1 %v883_v49  ;;  %586 = vmatpush.bf16.msrb.mxu2 %v890_v50 }
  0x48   :  { %422 = vmatpush.bf16.msrb.mxu0 %v742_v26 }
  0x49   :  { %573 = vmatpush.bf16.msrb.mxu1 %v882_v51  ;;  %587 = vmatpush.bf16.msrb.mxu2 %v889_v52 }
  0x4c   :  { %423 = vmatpush.bf16.msrb.mxu0 %v734_v29 }
  0x4d   :  { %588 = vmatpush.bf16.msrb.mxu2 %v888_v63  ;;  %574 = vmatpush.bf16.msrb.mxu1 %v881_v0 }
  0x50   :  { %424 = vmatpush.bf16.msrb.mxu0 %v726_v35 }
  0x51   :  { %589 = vmatpush.bf16.msrb.mxu2 %v887_v1  ;;  %575 = vmatpush.bf16.msrb.mxu1 %v880_v2 }
  0x54   :  { %425 = vmatpush.bf16.msrb.mxu0 %v718_v41 }
  0x55   :  { %576 = vmatpush.bf16.msrb.mxu1 %v879_v3 }
  0xb4   :  { %v208_v54 = vpop.f32.mrf.mxu0 }
  0xb5   :  { %v221_v57 = vpop.f32.mrf.mxu1  ;;  %v209_v11 = vadd.f32 %v208_v54, %v115_v8 }
  0xb6   :  { %v222_v6 = vadd.f32 %v221_v57, %v116_v5 }
  0xb7   :  { %v303_v55 = vpop.f32.mrf.mxu2 }
  0xb8   :  { %v304_v56 = vadd.f32 %v904_v53, %v303_v55 }
  0xba   :  { %v307_v58 = vmax.f32 %v304_v56, 0.0 }
  0xbc   :  { %v308_v59 = vpack.c.bf16 %v307_v58, %v307_v58  ;;  %v210_v60 = vpop.f32.mrf.mxu0 }
  0xbd   :  { %v223_v62 = vpop.f32.mrf.mxu1 }
  0xbe   :  { %413 = vmatmul.bf16.vlgmr.msra.gmra.mxu3 %v308_v59  ;;  %426 = vmatmul.bf16.vlgmr.msrb.gmra.mxu0 %v308_v59 }
  0xbf   :  { %v305_v61 = vpop.f32.mrf.mxu2 }
 0x13b   :  { %v427_v7 = vpop.f32.mrf.mxu0 }
 0x13c   :  { %v432_v9 = vadd.f32 %v427_v7, %v222_v6 }
 0x13e   :  { %v434_v10 = vmax.f32 %v432_v9, 0.0 }
 0x140   :  { %v436_v12 = vpack.c.bf16 %v434_v10, %v434_v10 }
 0x141   :  { %v414_v13 = vpop.f32.mrf.mxu3 }
 0x142   :  { %v431_v14 = vadd.f32 %v414_v13, %v209_v11  ;;  %590 = vmatmul.bf16.vlgmr.msrb.gmra.mxu2 %v436_v12 }
 0x143   :  { %v429_v15 = vpop.f32.mrf.mxu0 }
 0x144   :  { %v433_v16 = vmax.f32 %v431_v14, 0.0 }
 0x146   :  { %v435_v17 = vpack.c.bf16 %v433_v16, %v433_v16 }
 0x148   :  { %577 = vmatmul.bf16.vlgmr.msrb.gmra.mxu1 %v435_v17 }
 0x149   :  { %v416_v18 = vpop.f32.mrf.mxu3 }
 0x1c5   :  { %v578_v20 = vpop.f32.mrf.mxu1  ;;  %v591_v21 = vpop.f32.mrf.mxu2 }
 0x1c6   :  { %v579_v22 = vadd.f32 %v905_v19, %v578_v20 }
 0x1c8   :  { %v592_v23 = vadd.f32 %v591_v21, %v579_v22 }
 0x1ca   :  { %595 = vst [vmem:[#allocation10] sm:$0xff] %v592_v23 }
 0x1cb   :  { %606 = dma.vmem_to_hbm [thread:$0]  %s602_s15, 128, %s604_s18, [#allocation4]  }
 0x1cd   :  { %v580_v24 = vpop.f32.mrf.mxu1  ;;  %v593_v25 = vpop.f32.mrf.mxu2 }
 0x1ce   :  { %1032 = dma.done.wait [#allocation4], 128  }
 0x1cf   :  { %1033 = vsyncadd [#allocation4], 4294967168 }
 0x1d0   :  { %611 = vsyncpa [#allocation3], 1 }
 0x1d1   :  { %612 = vsyncpa [#allocation6], 1 }
 0x1d2   :  { %613 = vsyncpa [#allocation9], 1 }
 0x1d3   :  { %614 = vsyncpa [#allocation4], 1 }

</bundles_post_ra>
